<compile_context>
chip_gen: v7x
topology: tpu7x:2x2x1
jax: 0.10.0
libtpu: 0.0.40
codegen_flags: <defaults>
</compile_context>

<pallas_src>
import functools
import math

import jax
import jax.numpy as jnp
from jax.experimental import pallas as pl
from jax.experimental.pallas import tpu as pltpu


def _round_up(x, m):
    return ((x + m - 1) // m) * m


# ----------------------------- Pallas kernels -------------------------------

def _dirgcn_small_kernel(adj_ref, xs_ref, dout_ref, b_ref, o_ref):
    # Single-block fast path: one MXU pass, fused scale + bias.
    acc = jnp.dot(adj_ref[...], xs_ref[...], preferred_element_type=jnp.float32)
    o_ref[...] = acc * dout_ref[...] + b_ref[...]


def _dirgcn_tiled_kernel(adj_ref, xs_ref, dout_ref, b_ref, o_ref, *, tk):
    # adj_ref:  [tm, tk]          raw binary adjacency tile (bf16/f32, exact)
    # xs_ref:   [tk, F_pad] or [n_pad, F_pad]  D_in^{-1/2}-scaled x @ W_f^T
    # dout_ref: [tm, 1]           D_out^{-1/2} for this row block (f32)
    # b_ref:    [1, F_pad]        fused bias (f32)
    # o_ref:    [tm, F_pad]       f32 output block, VMEM-resident across k
    #                             (used directly as the accumulator).
    k = pl.program_id(1)

    @pl.when(k == 0)
    def _():
        o_ref[...] = jnp.zeros_like(o_ref)

    if xs_ref.shape[0] == tk:
        # Blocked xs stream (or single reduction block).
        xs = xs_ref[...]
    else:
        # xs fully resident in VMEM: slice the current reduction window.
        xs = xs_ref[pl.ds(pl.multiple_of(k * tk, tk), tk), :]

    o_ref[...] += jnp.dot(adj_ref[...], xs, preferred_element_type=jnp.float32)

    @pl.when(k == pl.num_programs(1) - 1)
    def _():
        # Apply D_out^{-1/2} per output row and add the fused bias.
        o_ref[...] = o_ref[...] * dout_ref[...] + b_ref[...]


# ------------------------------ Forward wrapper ------------------------------

def dirgcn_forward(x, edge_index, params, alpha, *,
                   compute_dtype=jnp.bfloat16, tile_override=None):
    n, _ = x.shape
    f_out = params["w1"].shape[0]
    a = jnp.float32(alpha)
    ew = jnp.dtype(compute_dtype).itemsize

    # adj and adj_t are constructed identically in the reference module, so
    # adj_t_norm == adj_norm and the two Linears fuse exactly.
    w_f = a * params["w1"] + (1.0 - a) * params["w2"]   # [F_out, F_in]
    b_f = a * params["b1"] + (1.0 - a) * params["b2"]   # [F_out]

    f_pad = _round_up(max(f_out, 128), 128)   # lane-dense output

    # ---- path / tile selection -------------------------------------------
    if tile_override is not None:
        tiled = True
        tm, tk = tile_override
        n_pad = _round_up(n, math.lcm(tm, tk))
    else:
        n_small = _round_up(n, 128)
        small_bytes = n_small * n_small * ew + n_small * f_pad * (ew + 4)
        if small_bytes <= 6 * 1024 * 1024:          # comfy even on v5e
            tiled = False
            tm = tk = n_pad = n_small
        else:
            tiled = True
            tm = 512
            tk_max = 2048 if ew <= 2 else 1024       # keep A blocks <= 2 MiB
            tk = min(tk_max, _round_up(n, tm))
            n_pad = _round_up(n, tk)
            # v7x: keep the row-block ("parallel") count even so both
            # TensorCores get work.
            if (n_pad // tm) > 1 and (n_pad // tm) % 2 == 1:
                tm //= 2

    # ---- raw binary adjacency, built directly at padded size in the -------
    # ---- streaming dtype (0/1 exact in bf16; no pad/astype N^2 copies) ----
    row, col = edge_index[0], edge_index[1]
    # PyTorch: adj = SparseTensor(row=col, col=row) -> adj[col, row] = 1.
    # Duplicate edges coalesce to 1.0 (.set), matching the previous version.
    adj_p = jnp.zeros((n_pad, n_pad), compute_dtype).at[col, row].set(1.0)

    # Degrees as streaming f32 reductions over the binary adjacency (exact).
    in_deg = jnp.sum(adj_p, axis=0, dtype=jnp.float32)     # column sums
    out_deg = jnp.sum(adj_p, axis=1, dtype=jnp.float32)    # row sums
    in_inv_sqrt = jnp.where(in_deg > 0,
                            jax.lax.rsqrt(jnp.maximum(in_deg, 1e-30)), 0.0)
    out_inv_sqrt = jnp.where(out_deg > 0,
                             jax.lax.rsqrt(jnp.maximum(out_deg, 1e-30)), 0.0)

    # Tiny pre-projection in plain XLA; reassociate (A@x)@W^T -> A@(x@W^T),
    # then fold D_in^{-1/2} into its rows.
    xp = jnp.dot(x, w_f.T)                                   # [N, F_out] f32
    xp_p = jnp.pad(xp, ((0, n_pad - n), (0, f_pad - f_out)))
    xs_p = (xp_p * in_inv_sqrt[:, None]).astype(compute_dtype)
    dout_p = out_inv_sqrt.reshape(n_pad, 1).astype(jnp.float32)
    b_p = jnp.pad(b_f, (0, f_pad - f_out)).reshape(1, f_pad).astype(jnp.float32)

    # ---- small-N fast path -------------------------------------------------
    if not tiled:
        out = pl.pallas_call(
            _dirgcn_small_kernel,
            out_shape=jax.ShapeDtypeStruct((n_pad, f_pad), jnp.float32),
        )(adj_p, xs_p, dout_p, b_p)
        return out[:n, :f_out]

    # ---- tiled streaming path ----------------------------------------------
    # Keep xs fully VMEM-resident (loaded once) when it is small; otherwise
    # stream (tk, F_pad) blocks.
    if n_pad * f_pad * ew <= 4 * 1024 * 1024:
        xs_spec = pl.BlockSpec((n_pad, f_pad), lambda i, k: (0, 0))
    else:
        xs_spec = pl.BlockSpec((tk, f_pad), lambda i, k: (k, 0))

    grid = (n_pad // tm, n_pad // tk)
    cost = pl.CostEstimate(
        flops=2 * n_pad * n_pad * f_pad,
        transcendentals=0,
        bytes_accessed=(n_pad * n_pad * ew          # adjacency stream
                        + n_pad * f_pad * (ew + 4)  # xs read + f32 output
                        + n_pad * 4 + f_pad * 4),   # dout + bias
    )

    out = pl.pallas_call(
        functools.partial(_dirgcn_tiled_kernel, tk=tk),
        out_shape=jax.ShapeDtypeStruct((n_pad, f_pad), jnp.float32),
        grid_spec=pltpu.PrefetchScalarGridSpec(
            num_scalar_prefetch=0,
            grid=grid,
            in_specs=[
                pl.BlockSpec((tm, tk), lambda i, k: (i, k)),    # A tile
                xs_spec,                                        # xs (resident or blocked)
                pl.BlockSpec((tm, 1), lambda i, k: (i, 0)),     # D_out^{-1/2} rows
                pl.BlockSpec((1, f_pad), lambda i, k: (0, 0)),  # fused bias
            ],
            out_specs=pl.BlockSpec((tm, f_pad), lambda i, k: (i, 0)),
        ),
        compiler_params=pltpu.CompilerParams(
            dimension_semantics=("parallel", "arbitrary")),
        cost_estimate=cost,
    )(adj_p, xs_p, dout_p, b_p)

    # TODO(synk): on v7x, store the binary adjacency as fp8 (e4m3; 0/1 exact)
    # to halve the dominant HBM stream; on v6e/v5e evaluate an int8 A path.
    return out[:n, :f_out]


# ------------------------------- Reference ----------------------------------

def build_dense_adj(edge_index, num_nodes):
    # PyTorch code: adj = SparseTensor(row=col, col=row) -> adj[col, row] = 1
    row, col = edge_index[0], edge_index[1]
    adj = jnp.zeros((num_nodes, num_nodes), dtype=jnp.float32)
    adj = adj.at[col, row].set(1.0)
    return adj


def directed_norm(adj):
    # D_out^{-1/2} A D_in^{-1/2}, with inf (zero-degree) replaced by 0.
    in_deg = adj.sum(axis=0)
    out_deg = adj.sum(axis=1)
    in_inv_sqrt = jnp.where(in_deg > 0, jax.lax.rsqrt(jnp.maximum(in_deg, 1e-30)), 0.0)
    out_inv_sqrt = jnp.where(out_deg > 0, jax.lax.rsqrt(jnp.maximum(out_deg, 1e-30)), 0.0)
    return out_inv_sqrt[:, None] * adj * in_inv_sqrt[None, :]


def dirgcn_reference(x, edge_index, params, alpha):
    num_nodes = x.shape[0]
    adj_norm = directed_norm(build_dense_adj(edge_index, num_nodes))
    adj_t_norm = adj_norm  # built identically in the reference module
    y1 = (adj_norm @ x) @ params["w1"].T + params["b1"]
    y2 = (adj_t_norm @ x) @ params["w2"].T + params["b2"]
    return alpha * y1 + (1 - alpha) * y2


# --------------------------------- Main --------------------------------------

def _make_case(key, num_nodes, input_dim, output_dim, num_edges):
    k_x, k_src, k_dst, k_w1, k_b1, k_w2, k_b2 = jax.random.split(key, 7)
    x = jax.random.normal(k_x, (num_nodes, input_dim), dtype=jnp.float32)
    src = jax.random.randint(k_src, (num_edges,), 0, num_nodes)
    dst = jax.random.randint(k_dst, (num_edges,), 0, num_nodes)
    edge_index = jnp.stack([src, dst], axis=0)  # [2, num_edges]
    bound = 1.0 / (input_dim ** 0.5)
    params = {
        "w1": jax.random.uniform(k_w1, (output_dim, input_dim), jnp.float32, -bound, bound),
        "b1": jax.random.uniform(k_b1, (output_dim,), jnp.float32, -bound, bound),
        "w2": jax.random.uniform(k_w2, (output_dim, input_dim), jnp.float32, -bound, bound),
        "b2": jax.random.uniform(k_b2, (output_dim,), jnp.float32, -bound, bound),
    }
    return x, edge_index, params


if __name__ == "__main__":
    key = jax.random.PRNGKey(0)
    alpha = 0.3
    k1, k2 = jax.random.split(key)

    # Case 1: module-scale shapes -> small-N single-block fast path.
    x, ei, params = _make_case(k1, 64, 32, 16, 256)
    ref = dirgcn_reference(x, ei, params, alpha)

    out_f32 = jax.block_until_ready(
        dirgcn_forward(x, ei, params, alpha, compute_dtype=jnp.float32))
    assert out_f32.shape == (64, 16)
    assert jnp.allclose(out_f32, ref, atol=1e-4, rtol=1e-4), (
        f"f32 max err {jnp.max(jnp.abs(out_f32 - ref))}")

    out_bf16 = jax.block_until_ready(
        dirgcn_forward(x, ei, params, alpha, compute_dtype=jnp.bfloat16))
    assert out_bf16.shape == (64, 16)
    assert jnp.allclose(out_bf16, ref, atol=2e-2, rtol=2e-2), (
        f"bf16 max err {jnp.max(jnp.abs(out_bf16 - ref))}")

    # Case 2: exercise the tiled accumulate-into-output kernel (with resident
    # xs + in-kernel pl.ds slicing + epilogue) at still-small shapes.
    x2, ei2, params2 = _make_case(k2, 384, 32, 16, 2048)
    ref2 = dirgcn_reference(x2, ei2, params2, alpha)
    out2 = jax.block_until_ready(
        dirgcn_forward(x2, ei2, params2, alpha, compute_dtype=jnp.float32,
                       tile_override=(128, 128)))
    assert out2.shape == (384, 16)
    assert jnp.allclose(out2, ref2, atol=1e-4, rtol=1e-4), (
        f"tiled f32 max err {jnp.max(jnp.abs(out2 - ref2))}")

    # TODO(synk): for genuinely sparse, very large graphs replace the dense
    # [N,N] adjacency with a blocked-CSR layout driven by scalar prefetch.

    print("KERNEL_OK")
</pallas_src>

<mosaic_0001>
module attributes {stable_mosaic.version = 11 : i64} {
  func.func @_dirgcn_small_kernel(%arg0: memref<128x128xf32, #tpu.memory_space<vmem>>, %arg1: memref<128x128xf32, #tpu.memory_space<vmem>>, %arg2: memref<128x1xf32, #tpu.memory_space<vmem>>, %arg3: memref<1x128xf32, #tpu.memory_space<vmem>>, %arg4: memref<128x128xf32, #tpu.memory_space<vmem>>) attributes {dimension_semantics = [], scalar_prefetch = 0 : i64, scratch_operands = 0 : i64, tpu.core_type = #tpu.core_type<tc>} {
    %c0 = arith.constant 0 : index
    %c0_0 = arith.constant 0 : index
    %0 = vector.load %arg0[%c0, %c0_0] : memref<128x128xf32, #tpu.memory_space<vmem>>, vector<128x128xf32>
    %c0_1 = arith.constant 0 : index
    %c0_2 = arith.constant 0 : index
    %1 = vector.load %arg1[%c0_1, %c0_2] : memref<128x128xf32, #tpu.memory_space<vmem>>, vector<128x128xf32>
    %cst = arith.constant dense<0.000000e+00> : vector<128x128xf32>
    %2 = tpu.matmul %0, %1, %cst {dimension_numbers = #tpu.dot_dimension_numbers<[1], [0], [0], [1], [0, 0, 1, 1], [], []>} : vector<128x128xf32>, vector<128x128xf32>, vector<128x128xf32> -> vector<128x128xf32>
    %c0_3 = arith.constant 0 : index
    %c0_4 = arith.constant 0 : index
    %3 = vector.load %arg2[%c0_3, %c0_4] : memref<128x1xf32, #tpu.memory_space<vmem>>, vector<128x1xf32>
    %4 = vector.broadcast %3 : vector<128x1xf32> to vector<128x128xf32>
    %5 = arith.mulf %2, %4 : vector<128x128xf32>
    %c0_5 = arith.constant 0 : index
    %c0_6 = arith.constant 0 : index
    %6 = vector.load %arg3[%c0_5, %c0_6] : memref<1x128xf32, #tpu.memory_space<vmem>>, vector<1x128xf32>
    %7 = vector.broadcast %6 : vector<1x128xf32> to vector<128x128xf32>
    %8 = arith.addf %5, %7 : vector<128x128xf32>
    %c0_7 = arith.constant 0 : index
    %c0_8 = arith.constant 0 : index
    %9 = vector.load %arg4[%c0_7, %c0_8] : memref<128x128xf32, #tpu.memory_space<vmem>>, vector<128x128xf32>
    tpu.vector_store %arg4[%c0_7, %c0_8], %8 {strides = array<i32>} : memref<128x128xf32, #tpu.memory_space<vmem>>, vector<128x128xf32>,
    return
  }
}

</mosaic_0001>

<bundles_post_ra>
// kernel: tpu_custom_call.1
= control target key start
LH: loop header
LB: loop body
LE: loop exit
PB: predicated region body
PF: predicated region fallthrough
CT: control target
= control target key end

     0   :  { %9 = vsyncpa [#allocation3], 0  ;;  %s749_s0 = inlined_call_operand.vmem [shape: f32[128,128], index: 0, kind: input, shape index: {}]   ;;  %s750_s1 = inlined_call_operand.hbm [shape: f32[128,128], index: 1, kind: input, shape index: {}]   ;;  %s751_s2 = inlined_call_operand.vmem [shape: f32[128,1], index: 2, kind: input, shape index: {}]   ;;  %s752_s3 = inlined_call_operand.vmem [shape: f32[1,128], index: 3, kind: input, shape index: {}]   ;;  %s753_s4 = inlined_call_operand.hbm [shape: f32[128,128], index: 4, kind: output, shape index: {}]  }
   0x1   :  { %10 = vsyncpa [#allocation4], 0  ;;  %s569_s15 = smov [#allocation2]   ;;  %s521_s19 = scalar_lea.hbm %s750_s1, 2048 }
   0x2   :  { %s18_s16 = sshll.u32 %s569_s15, 4  ;;  %p522_p0 = scmp.ne.s32.totalorder %s750_s1, %s521_s19  ;;  %s19_s16 = int_to_ptr.vmem [resolvable:$true] %s18_s16 }
   0x3   :  { %p525_p1 = scmp.lt.u32.totalorder %s521_s19, %s750_s1 }
   0x5   :  { %p527_p2 = pnand %p525_p1, %p522_p0 }
   0x7   :  { %530 = shalt.err (!%p527_p2)
}
   0x8   :  { %s531_s24 = scalar_lea.vmem %s19_s16, 2048  ;;  %p536_p4 = scmp.lt.s32.totalorder %s19_s16, %s19_s16 }
   0x9   :  { %p532_p3 = scmp.ne.s32.totalorder %s19_s16, %s531_s24  ;;  %p537_p5 = scmp.lt.s32.totalorder %s531_s24, %s531_s24 }
   0xb   :  { %p538_p6 = por %p537_p5, %p536_p4 }
   0xd   :  { %p539_p7 = pnand %p538_p6, %p532_p3 }
   0xf   :  { %542 = shalt.err (!%p539_p7)
}
  0x10   :  { %s570_s25 = smov 128   ;;  %s571_s26 = smov 8  }
  0x11   :  { %24 = dma.hbm_to_vmem [thread:$0]  %s750_s1, 2048, %s19_s16, [#allocation3], %s570_s25, %s570_s25, %s571_s26  }
  0x12   :  { %565 = dma.done.wait [#allocation3], 2048  }
  0x13   :  { %566 = vsyncadd [#allocation3], 4294965248  ;;  %v572_v0 = vmov 0   ;;  %v48_v1 = vld [vmem:[#allocation2] sm:$0xff]  ;;  %v49_v2 = vld [vmem:[#allocation2 + $0x8] sm:$0xff] }
  0x14   :  { %520 = vset.pattern.permute.xlu1 %v572_v0  ;;  %519 = vset.pattern.permute.xlu0 %v572_v0  ;;  %v50_v3 = vld [vmem:[#allocation2 + $0x10] sm:$0xff]  ;;  %v466_v4 = vpack.c.bf16 %v49_v2, %v48_v1  ;;  %v51_v5 = vld [vmem:[#allocation2 + $0x18] sm:$0xff]  ;;  %v52_v7 = vld [vmem:[#allocation2 + $0x20] sm:$0xff] }
  0x15   :  { %v470_v6 = vpack.c.bf16 %v51_v5, %v50_v3  ;;  %v53_v8 = vld [vmem:[#allocation2 + $0x28] sm:$0xff]  ;;  %v32_v10 = vld [vmem:[%s749_s0] sm:$0xff]  ;;  %v54_v12 = vld [vmem:[#allocation2 + $0x30] sm:$0xff] }
  0x16   :  { %467 = vmatprep.subr.bf16.mxu0 %v466_v4  ;;  %498 = vmatprep.subr.bf16.mxu1 %v466_v4  ;;  %v474_v9 = vpack.c.bf16 %v53_v8, %v52_v7  ;;  %v40_v11 = vld [vmem:[%s749_s0 + $0x40] sm:$0xff]  ;;  %v55_v13 = vld [vmem:[#allocation2 + $0x38] sm:$0xff]  ;;  %v57_v16 = vld [vmem:[#allocation2 + $0x48] sm:$0xff] }
  0x17   :  { %469 = vmatpush3.bf16.msra.mxu0 %v466_v4  ;;  %506 = vmatpush3.bf16.msra.mxu1 %v466_v4  ;;  %v478_v14 = vpack.c.bf16 %v55_v13, %v54_v12  ;;  %v56_v15 = vld [vmem:[#allocation2 + $0x40] sm:$0xff]  ;;  %v211_v17 = vld [vmem:[%s751_s2 + $0x10] sm:$0xff]  ;;  %v212_v19 = vld [vmem:[%s751_s2 + $0x18] sm:$0xff] }
  0x18   :  { %471 = vmatprep.subr.bf16.mxu0 %v470_v6  ;;  %499 = vmatprep.subr.bf16.mxu1 %v470_v6  ;;  %v209_v18 = vld [vmem:[%s751_s2] sm:$0xff]  ;;  %v482_v20 = vpack.c.bf16 %v57_v16, %v56_v15  ;;  %v58_v21 = vld [vmem:[#allocation2 + $0x50] sm:$0xff]  ;;  %v59_v22 = vld [vmem:[#allocation2 + $0x58] sm:$0xff] }
  0x19   :  { %442 = vmatprep.mubr.f32.mxu0 %v32_v10  ;;  %454 = vmatprep.mubr.f32.mxu1 %v40_v11  ;;  %v210_v23 = vld [vmem:[%s751_s2 + $0x8] sm:$0xff]  ;;  %v486_v25 = vpack.c.bf16 %v59_v22, %v58_v21  ;;  %v60_v26 = vld [vmem:[#allocation2 + $0x60] sm:$0xff]  ;;  %v216_v29 = vld [vmem:[%s751_s2 + $0x38] sm:$0xff] }
  0x1a   :  { %237 = vperm.xlu1 %520, %v211_v17   ;;  %227 = vperm.xlu0 %519, %v209_v18   ;;  %v214_v24 = vld [vmem:[%s751_s2 + $0x28] sm:$0xff]  ;;  %v213_v28 = vld [vmem:[%s751_s2 + $0x20] sm:$0xff]  ;;  %v62_v31 = vld [vmem:[#allocation2 + $0x70] sm:$0xff] }
  0x1b   :  { %473 = vmatpush3.bf16.msra.mxu0 %v470_v6  ;;  %507 = vmatpush3.bf16.msra.mxu1 %v470_v6  ;;  %v61_v27 = vld [vmem:[#allocation2 + $0x68] sm:$0xff]  ;;  %v63_v32 = vld [vmem:[#allocation2 + $0x78] sm:$0xff]  ;;  %v215_v33 = vld [vmem:[%s751_s2 + $0x30] sm:$0xff] }
  0x1c   :  { %475 = vmatprep.subr.bf16.mxu0 %v474_v9  ;;  %500 = vmatprep.subr.bf16.mxu1 %v474_v9  ;;  %v490_v30 = vpack.c.bf16 %v61_v27, %v60_v26  ;;  %v218_v34 = vld [vmem:[%s751_s2 + $0x48] sm:$0xff]  ;;  %v494_v35 = vpack.c.bf16 %v63_v32, %v62_v31  ;;  %v217_v36 = vld [vmem:[%s751_s2 + $0x40] sm:$0xff]  ;;  %v220_v37 = vld [vmem:[%s751_s2 + $0x58] sm:$0xff] }
  0x1d   :  { %v219_v38 = vld [vmem:[%s751_s2 + $0x50] sm:$0xff]  ;;  %v33_v39 = vld [vmem:[%s749_s0 + $0x8] sm:$0xff]  ;;  %v221_v44 = vld [vmem:[%s751_s2 + $0x60] sm:$0xff] }
  0x1e   :  { %242 = vperm.xlu1 %520, %v212_v19   ;;  %232 = vperm.xlu0 %519, %v210_v23   ;;  %v41_v40 = vld [vmem:[%s749_s0 + $0x48] sm:$0xff]  ;;  %v34_v41 = vld [vmem:[%s749_s0 + $0x10] sm:$0xff]  ;;  %v35_v45 = vld [vmem:[%s749_s0 + $0x18] sm:$0xff] }
  0x1f   :  { %477 = vmatpush3.bf16.msra.mxu0 %v474_v9  ;;  %508 = vmatpush3.bf16.msra.mxu1 %v474_v9  ;;  %v42_v42 = vld [vmem:[%s749_s0 + $0x50] sm:$0xff]  ;;  %v222_v43 = vld [vmem:[%s751_s2 + $0x68] sm:$0xff]  ;;  %v43_v46 = vld [vmem:[%s749_s0 + $0x58] sm:$0xff] }
  0x20   :  { %479 = vmatprep.subr.bf16.mxu0 %v478_v14  ;;  %501 = vmatprep.subr.bf16.mxu1 %v478_v14  ;;  %v36_v47 = vld [vmem:[%s749_s0 + $0x20] sm:$0xff]  ;;  %v224_v49 = vld [vmem:[%s751_s2 + $0x78] sm:$0xff]  ;;  %v223_v50 = vld [vmem:[%s751_s2 + $0x70] sm:$0xff] }
  0x21   :  { %v44_v48 = vld [vmem:[%s749_s0 + $0x60] sm:$0xff]  ;;  %v37_v51 = vld [vmem:[%s749_s0 + $0x28] sm:$0xff]  ;;  %v38_v53 = vld [vmem:[%s749_s0 + $0x30] sm:$0xff] }
  0x22   :  { %252 = vperm.xlu1 %520, %v214_v24   ;;  %247 = vperm.xlu0 %519, %v213_v28   ;;  %v45_v52 = vld [vmem:[%s749_s0 + $0x68] sm:$0xff]  ;;  %v46_v54 = vld [vmem:[%s749_s0 + $0x70] sm:$0xff]  ;;  %v39_v55 = vld [vmem:[%s749_s0 + $0x38] sm:$0xff] }
  0x23   :  { %481 = vmatpush3.bf16.msra.mxu0 %v478_v14  ;;  %509 = vmatpush3.bf16.msra.mxu1 %v478_v14  ;;  %v47_v56 = vld [vmem:[%s749_s0 + $0x78] sm:$0xff]  ;;  %v715_v6 = vld [vmem:[%s752_s3] ss:$0 sm:$0xff]  ;;  %s573_s0 = smov [#allocation5]  }
  0x24   :  { %483 = vmatprep.subr.bf16.mxu0 %v482_v20  ;;  %502 = vmatprep.subr.bf16.mxu1 %v482_v20  ;;  %s365_s3 = sshll.u32 %s573_s0, 4  ;;  %s366_s3 = int_to_ptr.vmem [resolvable:$true] %s365_s3 }
  0x25   :  { %s543_s17 = scalar_lea.vmem %s366_s3, 2048  ;;  %p548_p9 = scmp.lt.s32.totalorder %s366_s3, %s366_s3 }
  0x26   :  { %262 = vperm.xlu1 %520, %v216_v29   ;;  %257 = vperm.xlu0 %519, %v215_v33   ;;  %p544_p8 = scmp.ne.s32.totalorder %s366_s3, %s543_s17  ;;  %p549_p10 = scmp.lt.s32.totalorder %s543_s17, %s543_s17 }
  0x27   :  { %485 = vmatpush3.bf16.msra.mxu0 %v482_v20  ;;  %510 = vmatpush3.bf16.msra.mxu1 %v482_v20 }
  0x28   :  { %487 = vmatprep.subr.bf16.mxu0 %v486_v25  ;;  %503 = vmatprep.subr.bf16.mxu1 %v486_v25  ;;  %p550_p11 = por %p549_p10, %p548_p9 }
  0x2a   :  { %272 = vperm.xlu1 %520, %v218_v34   ;;  %267 = vperm.xlu0 %519, %v217_v36   ;;  %p551_p12 = pnand %p550_p11, %p544_p8 }
  0x2b   :  { %489 = vmatpush3.bf16.msra.mxu0 %v486_v25  ;;  %511 = vmatpush3.bf16.msra.mxu1 %v486_v25 }
  0x2c   :  { %491 = vmatprep.subr.bf16.mxu0 %v490_v30  ;;  %504 = vmatprep.subr.bf16.mxu1 %v490_v30 }
  0x2e   :  { %282 = vperm.xlu1 %520, %v220_v37   ;;  %277 = vperm.xlu0 %519, %v219_v38  }
  0x2f   :  { %493 = vmatpush3.bf16.msra.mxu0 %v490_v30  ;;  %512 = vmatpush3.bf16.msra.mxu1 %v490_v30 }
  0x30   :  { %495 = vmatprep.subr.bf16.mxu0 %v494_v35  ;;  %505 = vmatprep.subr.bf16.mxu1 %v494_v35 }
  0x32   :  { %292 = vperm.xlu1 %520, %v222_v43   ;;  %287 = vperm.xlu0 %519, %v221_v44  }
  0x33   :  { %497 = vmatpush3.bf16.msra.mxu0 %v494_v35  ;;  %513 = vmatpush3.bf16.msra.mxu1 %v494_v35 }
  0x36   :  { %443 = vmatmul.mubr.f32.vlgmr.msra.gmra.mrb[0].mxu0 %v33_v39  ;;  %455 = vmatmul.mubr.f32.vlgmr.msra.gmra.mrb[0].mxu1 %v41_v40 }
  0x37   :  { %445 = vmatprep.mubr.f32.mxu0 %v34_v41  ;;  %457 = vmatprep.mubr.f32.mxu1 %v42_v42 }
  0x38   :  { %302 = vperm.xlu1 %520, %v224_v49   ;;  %297 = vperm.xlu0 %519, %v223_v50  }
  0x3a   :  { %446 = vmatmul.mubr.f32.gmra.mrb[2].mxu0 %v35_v45  ;;  %458 = vmatmul.mubr.f32.gmra.mrb[2].mxu1 %v43_v46 }
  0x3b   :  { %448 = vmatprep.mubr.f32.mxu0 %v36_v47  ;;  %460 = vmatprep.mubr.f32.mxu1 %v44_v48 }
  0x3e   :  { %449 = vmatmul.mubr.f32.gmra.mrb[4].mxu0 %v37_v51  ;;  %461 = vmatmul.mubr.f32.gmra.mrb[4].mxu1 %v45_v52 }
  0x3f   :  { %451 = vmatprep.mubr.f32.mxu0 %v38_v53  ;;  %463 = vmatprep.mubr.f32.mxu1 %v46_v54 }
  0x42   :  { %452 = vmatmul.mubr.f32.gmra.mrb[6].mxu0 %v39_v55  ;;  %464 = vmatmul.mubr.f32.gmra.mrb[6].mxu1 %v47_v56 }
  0x99   :  { %v238_v57 = vpop.permute.xlu1 %237  ;;  %v228_v58 = vpop.permute.xlu0 %227 }
  0x9d   :  { %v243_v59 = vpop.permute.xlu1 %242  ;;  %v233_v60 = vpop.permute.xlu0 %232 }
  0xa1   :  { %v253_v61 = vpop.permute.xlu1 %252  ;;  %v248_v62 = vpop.permute.xlu0 %247 }
  0xa5   :  { %v263_v63 = vpop.permute.xlu1 %262  ;;  %v710_v0 = vpop.permute.xlu0 %257 }
  0xa9   :  { %v273_v1 = vpop.permute.xlu1 %272  ;;  %v268_v2 = vpop.permute.xlu0 %267 }
  0xad   :  { %v283_v3 = vpop.permute.xlu1 %282  ;;  %v278_v4 = vpop.permute.xlu0 %277 }
  0xb1   :  { %v293_v14 = vpop.permute.xlu1 %292  ;;  %v288_v15 = vpop.permute.xlu0 %287 }
  0xb7   :  { %v303_v40 = vpop.permute.xlu1 %302  ;;  %v298_v41 = vpop.permute.xlu0 %297 }
 0x109   :  { %v444_v5 = vpop.f32.mrb[0].mxu0  ;;  %v456_v7 = vpop.f32.mrb[0].mxu1 }
 0x10a   :  { %v306_v8 = vmul.f32 %v444_v5, %v233_v60  ;;  %v314_v9 = vmul.f32 %v456_v7, %v273_v1  ;;  %v130_v10 = vpop.f32.mrb[1].mxu0  ;;  %v170_v11 = vpop.f32.mrb[1].mxu1 }
 0x10b   :  { %v305_v12 = vmul.f32 %v228_v58, %v130_v10  ;;  %v313_v13 = vmul.f32 %v268_v2, %v170_v11 }
 0x10c   :  { %v329_v16 = vadd.f32 %v715_v6, %v306_v8  ;;  %v337_v17 = vadd.f32 %v715_v6, %v314_v9 }
 0x10d   :  { %v328_v18 = vadd.f32 %v715_v6, %v305_v12  ;;  %v336_v19 = vadd.f32 %v715_v6, %v313_v13  ;;  %v447_v20 = vpop.f32.mrb[2].mxu0  ;;  %v459_v21 = vpop.f32.mrb[2].mxu1 }
 0x10e   :  { %345 = vst [vmem:[#allocation5 + $0x8] sm:$0xff] %v329_v16  ;;  %353 = vst [vmem:[#allocation5 + $0x48] sm:$0xff] %v337_v17  ;;  %v308_v22 = vmul.f32 %v447_v20, %v243_v59  ;;  %v316_v23 = vmul.f32 %v459_v21, %v283_v3  ;;  %v140_v24 = vpop.f32.mrb[3].mxu0  ;;  %v180_v25 = vpop.f32.mrb[3].mxu1 }
 0x10f   :  { %344 = vst [vmem:[#allocation5] sm:$0xff] %v328_v18  ;;  %352 = vst [vmem:[#allocation5 + $0x40] sm:$0xff] %v336_v19  ;;  %v307_v26 = vmul.f32 %v238_v57, %v140_v24  ;;  %v315_v27 = vmul.f32 %v278_v4, %v180_v25 }
 0x110   :  { %v331_v28 = vadd.f32 %v715_v6, %v308_v22  ;;  %v339_v29 = vadd.f32 %v715_v6, %v316_v23 }
 0x111   :  { %v330_v30 = vadd.f32 %v715_v6, %v307_v26  ;;  %v338_v31 = vadd.f32 %v715_v6, %v315_v27  ;;  %v450_v32 = vpop.f32.mrb[4].mxu0  ;;  %v462_v33 = vpop.f32.mrb[4].mxu1 }
 0x112   :  { %347 = vst [vmem:[#allocation5 + $0x18] sm:$0xff] %v331_v28  ;;  %355 = vst [vmem:[#allocation5 + $0x58] sm:$0xff] %v339_v29  ;;  %v310_v34 = vmul.f32 %v450_v32, %v253_v61  ;;  %v318_v35 = vmul.f32 %v462_v33, %v293_v14  ;;  %v150_v36 = vpop.f32.mrb[5].mxu0  ;;  %v190_v37 = vpop.f32.mrb[5].mxu1 }
 0x113   :  { %346 = vst [vmem:[#allocation5 + $0x10] sm:$0xff] %v330_v30  ;;  %354 = vst [vmem:[#allocation5 + $0x50] sm:$0xff] %v338_v31  ;;  %v309_v38 = vmul.f32 %v248_v62, %v150_v36  ;;  %v317_v39 = vmul.f32 %v288_v15, %v190_v37 }
 0x114   :  { %v333_v42 = vadd.f32 %v715_v6, %v310_v34  ;;  %v341_v43 = vadd.f32 %v715_v6, %v318_v35 }
 0x115   :  { %v332_v44 = vadd.f32 %v715_v6, %v309_v38  ;;  %v340_v45 = vadd.f32 %v715_v6, %v317_v39  ;;  %v453_v46 = vpop.f32.mrb[6].mxu0  ;;  %v465_v47 = vpop.f32.mrb[6].mxu1 }
 0x116   :  { %349 = vst [vmem:[#allocation5 + $0x28] sm:$0xff] %v333_v42  ;;  %357 = vst [vmem:[#allocation5 + $0x68] sm:$0xff] %v341_v43  ;;  %v312_v48 = vmul.f32 %v453_v46, %v263_v63  ;;  %v320_v49 = vmul.f32 %v465_v47, %v303_v40  ;;  %v160_v50 = vpop.f32.mrb[7].mxu0  ;;  %v200_v51 = vpop.f32.mrb[7].mxu1 }
 0x117   :  { %348 = vst [vmem:[#allocation5 + $0x20] sm:$0xff] %v332_v44  ;;  %356 = vst [vmem:[#allocation5 + $0x60] sm:$0xff] %v340_v45  ;;  %v311_v52 = vmul.f32 %v710_v0, %v160_v50  ;;  %v319_v53 = vmul.f32 %v298_v41, %v200_v51 }
 0x118   :  { %v335_v54 = vadd.f32 %v715_v6, %v312_v48  ;;  %v343_v55 = vadd.f32 %v715_v6, %v320_v49 }
 0x119   :  { %v334_v56 = vadd.f32 %v715_v6, %v311_v52  ;;  %v342_v57 = vadd.f32 %v715_v6, %v319_v53 }
 0x11a   :  { %351 = vst [vmem:[#allocation5 + $0x38] sm:$0xff] %v335_v54  ;;  %359 = vst [vmem:[#allocation5 + $0x78] sm:$0xff] %v343_v55 }
 0x11b   :  { %350 = vst [vmem:[#allocation5 + $0x30] sm:$0xff] %v334_v56  ;;  %358 = vst [vmem:[#allocation5 + $0x70] sm:$0xff] %v342_v57 }
 0x11c   :  { %554 = shalt.err (!%p551_p12)
}
 0x11d   :  { %s555_s20 = scalar_lea.hbm %s753_s4, 2048 }
 0x11e   :  { %p556_p13 = scmp.ne.s32.totalorder %s753_s4, %s555_s20  ;;  %p559_p0 = scmp.lt.u32.totalorder %s555_s20, %s753_s4 }
 0x120   :  { %p561_p1 = pnand %p559_p0, %p556_p13 }
 0x122   :  { %564 = shalt.err (!%p561_p1)
}
 0x123   :  { %371 = dma.vmem_to_hbm [thread:$0]  %s366_s3, 2048, %s753_s4, [#allocation4], %s570_s25, %s570_s25, %s571_s26  }
 0x124   :  { %567 = dma.done.wait [#allocation4], 2048  }
 0x125   :  { %568 = vsyncadd [#allocation4], 4294965248 }
 0x126   :  { %375 = vsyncpa [#allocation3], 1 }
 0x127   :  { %376 = vsyncpa [#allocation4], 1 }

</bundles_post_ra>
